<compile_context>
chip_gen: v5e
topology: v5e:2x2
jax: 0.10.0
libtpu: 0.0.40
codegen_flags: <defaults>
</compile_context>

<pallas_src>
import jax
import jax.numpy as jnp
import numpy as np
from jax import lax
from jax.experimental import pallas as pl
from jax.experimental.pallas import tpu as pltpu


def mhat2_kernel(me_ref, other_ref, wq_ref, bq_ref, wkv_ref, seg_ref,
                 gamma_ref, beta_ref, wo_ref, out_ref):
    F = wq_ref.shape[-1]                     # n_head * hidden_size (heads fused on lanes)
    me = me_ref[...]                         # (TB, Q)      bf16
    other = other_ref[...]                   # (TB, N, K)   bf16
    TB, N, K = other.shape

    # ---- fused head projections: bf16 MXU operands, f32 accumulation ----
    other2d = other.reshape(TB * N, K)
    q_all = jnp.dot(me, wq_ref[...], preferred_element_type=jnp.float32) + bq_ref[...]   # (TB, F)
    kv = jnp.dot(other2d, wkv_ref[...], preferred_element_type=jnp.float32)              # (TB*N, 2F)
    kv3 = kv.reshape(TB, N, 2 * F)
    k_all = kv3[:, :, :F]                    # (TB, N, F)  f32, lane-aligned slice
    v_all = kv3[:, :, F:]                    # (TB, N, F)  f32

    # ---- all-heads attention scores ----
    # Elementwise q*k on the VPU (f32), then one lane-dense MXU matmul with a
    # block-diagonal ones*(1/sqrt(H)) matrix: it sums each head's H lanes AND
    # broadcasts the per-head score back across those lanes in a single op.
    qk = q_all[:, None, :] * k_all                                      # (TB, N, F)
    s_bc = jnp.dot(qk.reshape(TB * N, F), seg_ref[...],
                   preferred_element_type=jnp.float32).reshape(TB, N, F)

    # ---- softmax over the N entities, once for all heads (f32; v5e has no bf16 VPU/EUP) ----
    m = jnp.max(s_bc, axis=1, keepdims=True)                            # (TB, 1, F)
    e = jnp.exp(s_bc - m)
    denom = jnp.sum(e, axis=1, keepdims=True)
    a = e * pl.reciprocal(denom, approx=True)                           # (TB, N, F)

    # ---- weighted sum over entities: concat-of-heads layout falls out directly ----
    c = jnp.sum(a * v_all, axis=1)                                      # (TB, F)

    # ---- LayerNorm (torch defaults: eps=1e-5, biased variance), f32 statistics ----
    mean = jnp.mean(c, axis=-1, keepdims=True)
    var = jnp.mean((c - mean) ** 2, axis=-1, keepdims=True)
    normed = (c - mean) * lax.rsqrt(var + 1e-5)
    normed = normed * gamma_ref[...] + beta_ref[...]

    act = jnp.maximum(normed, 0.0)                                      # ReLU
    # fc_o (no bias); out_size<128 -> masked stores, negligible write volume here.
    out_ref[...] = jnp.dot(act.astype(jnp.bfloat16), wo_ref[...],
                           preferred_element_type=jnp.float32)


def _choose_batch_tile(B, N):
    """cdiv-friendly batch tile: 8-sublane aligned, large enough to amortize ~0.35us/step,
    small enough that f32 (TB*N, F) intermediates stay well under scoped VMEM, and split
    so the grid has >=2 steps whenever the batch permits (keeps v7x's 2nd TC busy)."""
    if B < 8:
        return B                                        # block == full (tiny) batch dim
    cap = max(8, min(256, ((2048 // max(N, 1)) // 8) * 8))
    tb = min(cap, (B // 8) * 8)
    if -(-B // tb) < 2:                                 # would be a single grid step
        tb = max(8, ((-(-B // 2) + 7) // 8) * 8)        # halve -> 2 steps
        tb = min(tb, cap)
    return tb


def mhat2_forward(me, other, params):
    B, q_size = me.shape
    _, N, k_size = other.shape
    n_head, _, H = params["wq"].shape
    F = n_head * H
    out_size = params["wo"].shape[-1]
    scale = 1.0 / (H ** 0.5)

    # ---- host/XLA-side packing: lane-dense fused weight slabs, bf16 MXU operands ----
    wq = params["wq"].transpose(1, 0, 2).reshape(q_size, F).astype(jnp.bfloat16)
    wk = params["wk"].transpose(1, 0, 2).reshape(k_size, F)
    wv = params["wv"].transpose(1, 0, 2).reshape(k_size, F)
    wkv = jnp.concatenate([wk, wv], axis=-1).astype(jnp.bfloat16)       # (k_size, 2F)
    bq = params["bq"].reshape(1, F).astype(jnp.float32)                 # bias stays f32
    wo = params["wo"].astype(jnp.bfloat16)
    gamma = params["gamma"].reshape(1, F).astype(jnp.float32)
    beta = params["beta"].reshape(1, F).astype(jnp.float32)

    # Block-diagonal per-head segment-sum matrix with the 1/sqrt(H) scale folded in (f32,
    # so the scale is applied after exact products, not baked into rounded bf16 weights).
    head_ids = jnp.arange(F) // H
    seg = (head_ids[:, None] == head_ids[None, :]).astype(jnp.float32) * scale   # (F, F)

    me_b = me.astype(jnp.bfloat16)
    other_b = other.astype(jnp.bfloat16)

    TB = _choose_batch_tile(B, N)
    grid = (pl.cdiv(B, TB),)
    const = lambda b: (0, 0)

    flops = (2 * B * q_size * F                 # q projection
             + 2 * B * N * k_size * (2 * F)     # fused k|v projection
             + 2 * B * N * F * F                # segmented score sum + broadcast
             + 6 * B * N * F                    # q*k, softmax elementwise, a*v
             + 2 * B * F * out_size)            # output projection
    transcendentals = B * N * F                 # exp
    bytes_accessed = (me_b.size * 2 + other_b.size * 2
                      + wq.size * 2 + wkv.size * 2 + wo.size * 2
                      + (bq.size + seg.size + gamma.size + beta.size) * 4
                      + B * out_size * 4)

    return pl.pallas_call(
        mhat2_kernel,
        out_shape=jax.ShapeDtypeStruct((B, out_size), jnp.float32),
        grid=grid,
        in_specs=[
            pl.BlockSpec((TB, q_size), lambda b: (b, 0)),        # me
            pl.BlockSpec((TB, N, k_size), lambda b: (b, 0, 0)),  # other
            pl.BlockSpec((q_size, F), const),                    # wq (head-fused)
            pl.BlockSpec((1, F), const),                         # bq
            pl.BlockSpec((k_size, 2 * F), const),                # wk|wv fused slab
            pl.BlockSpec((F, F), const),                         # segment-sum (scaled)
            pl.BlockSpec((1, F), const),                         # LayerNorm gamma
            pl.BlockSpec((1, F), const),                         # LayerNorm beta
            pl.BlockSpec((F, out_size), const),                  # wo
        ],
        out_specs=pl.BlockSpec((TB, out_size), lambda b: (b, 0)),
        compiler_params=pltpu.CompilerParams(dimension_semantics=("parallel",)),
        cost_estimate=pl.CostEstimate(flops=int(flops),
                                      transcendentals=int(transcendentals),
                                      bytes_accessed=int(bytes_accessed)),
    )(me_b, other_b, wq, bq, wkv, seg, gamma, beta, wo)


# ---------------- deterministic parameter init (matches module shapes) -------

def _orthogonal(key, rows, cols):
    n = max(rows, cols)
    a = jax.random.normal(key, (n, n), dtype=jnp.float32)
    q, r = jnp.linalg.qr(a)
    q = q * jnp.sign(jnp.diagonal(r))
    return q[:rows, :cols]


def init_params(key, q_size, k_size, hidden_size, out_size, n_head):
    keys = jax.random.split(key, 3 * n_head + 1)
    # stored as (in, out) so x @ W == torch's x @ W.T
    wq = jnp.stack([_orthogonal(keys[i], q_size, hidden_size) for i in range(n_head)])
    wk = jnp.stack([_orthogonal(keys[n_head + i], k_size, hidden_size) for i in range(n_head)])
    wv = jnp.stack([_orthogonal(keys[2 * n_head + i], k_size, hidden_size) for i in range(n_head)])
    bq = jnp.zeros((n_head, 1, hidden_size), jnp.float32)          # bias init = 0
    wo = _orthogonal(keys[-1], n_head * hidden_size, out_size)
    gamma = jnp.ones((1, n_head * hidden_size), jnp.float32)       # LayerNorm defaults
    beta = jnp.zeros((1, n_head * hidden_size), jnp.float32)
    return dict(wq=wq, bq=bq, wk=wk, wv=wv, wo=wo, gamma=gamma, beta=beta)


# ---------------- pure-JAX reference (for correctness check) -----------------

def mhat2_ref(me, other, p):
    n_head, _, H = p["wq"].shape
    outs = []
    for h in range(n_head):
        q = me @ p["wq"][h] + p["bq"][h]
        k = jnp.einsum('bnk,kh->bnh', other, p["wk"][h])
        v = jnp.einsum('bnk,kh->bnh', other, p["wv"][h])
        a = jnp.einsum('bh,bnh->bn', q, k) / (H ** 0.5)
        a = jax.nn.softmax(a, axis=-1)            # mask path is dead code in torch fwd
        outs.append(jnp.einsum('bn,bnh->bh', a, v))
    c = jnp.concatenate(outs, axis=-1)
    mean = jnp.mean(c, -1, keepdims=True)
    var = jnp.mean((c - mean) ** 2, -1, keepdims=True)
    normed = (c - mean) / jnp.sqrt(var + 1e-5) * p["gamma"] + p["beta"]
    return jnp.maximum(normed, 0.0) @ p["wo"]


if __name__ == "__main__":
    B, N = 2, 8
    q_size, k_size, hidden_size, out_size, n_head = 16, 16, 32, 32, 4

    key = jax.random.PRNGKey(0)
    kp, km, ko = jax.random.split(key, 3)
    params = init_params(kp, q_size, k_size, hidden_size, out_size, n_head)
    me = jax.random.normal(km, (B, q_size), dtype=jnp.float32)
    other = jax.random.normal(ko, (B, N, k_size), dtype=jnp.float32)

    out = mhat2_forward(me, other, params)
    jax.block_until_ready(out)

    ref = mhat2_ref(me, other, params)
    np.testing.assert_allclose(np.asarray(out), np.asarray(ref), rtol=2e-2, atol=2e-2)
    print("KERNEL_OK")
</pallas_src>

<mosaic_0001>
module attributes {stable_mosaic.version = 11 : i64} {
  func.func @mhat2_kernel(%arg0: i32, %arg1: memref<2x16xbf16, #tpu.memory_space<vmem>>, %arg2: memref<2x8x16xbf16, #tpu.memory_space<vmem>>, %arg3: memref<16x128xbf16, #tpu.memory_space<vmem>>, %arg4: memref<1x128xf32, #tpu.memory_space<vmem>>, %arg5: memref<16x256xbf16, #tpu.memory_space<vmem>>, %arg6: memref<128x128xf32, #tpu.memory_space<vmem>>, %arg7: memref<1x128xf32, #tpu.memory_space<vmem>>, %arg8: memref<1x128xf32, #tpu.memory_space<vmem>>, %arg9: memref<128x32xbf16, #tpu.memory_space<vmem>>, %arg10: memref<2x32xf32, #tpu.memory_space<vmem>>) attributes {dimension_semantics = [#tpu.dimension_semantics<parallel>], iteration_bounds = array<i64: 1>, scalar_prefetch = 0 : i64, scratch_operands = 0 : i64, tpu.core_type = #tpu.core_type<tc>, window_params = [{transform_indices = @transform_0, window_bounds = array<i64: 2, 16>}, {transform_indices = @transform_1, window_bounds = array<i64: 2, 8, 16>}, {pipeline_mode = #tpu.pipeline_mode<synchronous>, transform_indices = @transform_2, window_bounds = array<i64: 16, 128>}, {pipeline_mode = #tpu.pipeline_mode<synchronous>, transform_indices = @transform_3, window_bounds = array<i64: 1, 128>}, {pipeline_mode = #tpu.pipeline_mode<synchronous>, transform_indices = @transform_4, window_bounds = array<i64: 16, 256>}, {pipeline_mode = #tpu.pipeline_mode<synchronous>, transform_indices = @transform_5, window_bounds = array<i64: 128, 128>}, {pipeline_mode = #tpu.pipeline_mode<synchronous>, transform_indices = @transform_6, window_bounds = array<i64: 1, 128>}, {pipeline_mode = #tpu.pipeline_mode<synchronous>, transform_indices = @transform_7, window_bounds = array<i64: 1, 128>}, {pipeline_mode = #tpu.pipeline_mode<synchronous>, transform_indices = @transform_8, window_bounds = array<i64: 128, 32>}, {transform_indices = @transform_9, window_bounds = array<i64: 2, 32>}]} {
    %c0 = arith.constant 0 : index
    %c0_0 = arith.constant 0 : index
    %0 = vector.load %arg1[%c0, %c0_0] : memref<2x16xbf16, #tpu.memory_space<vmem>>, vector<2x16xbf16>
    %c0_1 = arith.constant 0 : index
    %c0_2 = arith.constant 0 : index
    %c0_3 = arith.constant 0 : index
    %1 = vector.load %arg2[%c0_1, %c0_2, %c0_3] : memref<2x8x16xbf16, #tpu.memory_space<vmem>>, vector<2x8x16xbf16>
    %2 = vector.shape_cast %1 : vector<2x8x16xbf16> to vector<16x16xbf16>
    %c0_4 = arith.constant 0 : index
    %c0_5 = arith.constant 0 : index
    %3 = vector.load %arg3[%c0_4, %c0_5] : memref<16x128xbf16, #tpu.memory_space<vmem>>, vector<16x128xbf16>
    %cst = arith.constant dense<0.000000e+00> : vector<2x128xf32>
    %4 = tpu.matmul %0, %3, %cst {dimension_numbers = #tpu.dot_dimension_numbers<[1], [0], [0], [1], [0, 0, 1, 1], [], []>} : vector<2x16xbf16>, vector<16x128xbf16>, vector<2x128xf32> -> vector<2x128xf32>
    %c0_6 = arith.constant 0 : index
    %c0_7 = arith.constant 0 : index
    %5 = vector.load %arg4[%c0_6, %c0_7] : memref<1x128xf32, #tpu.memory_space<vmem>>, vector<1x128xf32>
    %6 = vector.broadcast %5 : vector<1x128xf32> to vector<2x128xf32>
    %7 = arith.addf %4, %6 : vector<2x128xf32>
    %c0_8 = arith.constant 0 : index
    %c0_9 = arith.constant 0 : index
    %8 = vector.load %arg5[%c0_8, %c0_9] : memref<16x256xbf16, #tpu.memory_space<vmem>>, vector<16x256xbf16>
    %cst_10 = arith.constant dense<0.000000e+00> : vector<16x256xf32>
    %9 = tpu.matmul %2, %8, %cst_10 {dimension_numbers = #tpu.dot_dimension_numbers<[1], [0], [0], [1], [0, 0, 1, 1], [], []>} : vector<16x16xbf16>, vector<16x256xbf16>, vector<16x256xf32> -> vector<16x256xf32>
    %10 = vector.shape_cast %9 : vector<16x256xf32> to vector<2x8x256xf32>
    %11 = vector.extract_strided_slice %10 {offsets = [0, 0, 0], sizes = [2, 8, 128], strides = [1, 1, 1]} : vector<2x8x256xf32> to vector<2x8x128xf32>
    %12 = vector.extract_strided_slice %10 {offsets = [0, 0, 128], sizes = [2, 8, 128], strides = [1, 1, 1]} : vector<2x8x256xf32> to vector<2x8x128xf32>
    %13 = vector.shape_cast %7 : vector<2x128xf32> to vector<2x1x128xf32>
    %14 = vector.broadcast %13 : vector<2x1x128xf32> to vector<2x8x128xf32>
    %15 = arith.mulf %14, %11 : vector<2x8x128xf32>
    %16 = vector.shape_cast %15 : vector<2x8x128xf32> to vector<16x128xf32>
    %c0_11 = arith.constant 0 : index
    %c0_12 = arith.constant 0 : index
    %17 = vector.load %arg6[%c0_11, %c0_12] : memref<128x128xf32, #tpu.memory_space<vmem>>, vector<128x128xf32>
    %cst_13 = arith.constant dense<0.000000e+00> : vector<16x128xf32>
    %18 = tpu.matmul %16, %17, %cst_13 {dimension_numbers = #tpu.dot_dimension_numbers<[1], [0], [0], [1], [0, 0, 1, 1], [], []>} : vector<16x128xf32>, vector<128x128xf32>, vector<16x128xf32> -> vector<16x128xf32>
    %19 = vector.shape_cast %18 : vector<16x128xf32> to vector<2x8x128xf32>
    %cst_14 = arith.constant dense<0xFF800000> : vector<2x128xf32>
    %20 = vector.multi_reduction <maximumf>, %19, %cst_14 [1] : vector<2x8x128xf32> to vector<2x128xf32>
    %21 = vector.shape_cast %20 : vector<2x128xf32> to vector<2x1x128xf32>
    %22 = vector.broadcast %21 : vector<2x1x128xf32> to vector<2x8x128xf32>
    %23 = arith.subf %19, %22 : vector<2x8x128xf32>
    %24 = math.exp %23 : vector<2x8x128xf32>
    %cst_15 = arith.constant dense<0.000000e+00> : vector<2x128xf32>
    %25 = vector.multi_reduction <add>, %24, %cst_15 [1] : vector<2x8x128xf32> to vector<2x128xf32>
    %26 = vector.shape_cast %25 : vector<2x128xf32> to vector<2x1x128xf32>
    %27 = tpu.reciprocal %26 {approx = true} : vector<2x1x128xf32> -> vector<2x1x128xf32>
    %28 = vector.broadcast %27 : vector<2x1x128xf32> to vector<2x8x128xf32>
    %29 = arith.mulf %24, %28 : vector<2x8x128xf32>
    %30 = arith.mulf %29, %12 : vector<2x8x128xf32>
    %cst_16 = arith.constant dense<0.000000e+00> : vector<2x128xf32>
    %31 = vector.multi_reduction <add>, %30, %cst_16 [1] : vector<2x8x128xf32> to vector<2x128xf32>
    %cst_17 = arith.constant dense<0.000000e+00> : vector<2xf32>
    %32 = vector.multi_reduction <add>, %31, %cst_17 [1] : vector<2x128xf32> to vector<2xf32>
    %33 = vector.shape_cast %32 : vector<2xf32> to vector<2x1xf32>
    %cst_18 = arith.constant 1.280000e+02 : f32
    %34 = vector.broadcast %cst_18 : f32 to vector<2x1xf32>
    %35 = arith.divf %33, %34 : vector<2x1xf32>
    %36 = vector.broadcast %35 : vector<2x1xf32> to vector<2x128xf32>
    %37 = arith.subf %31, %36 : vector<2x128xf32>
    %38 = arith.mulf %37, %37 : vector<2x128xf32>
    %cst_19 = arith.constant dense<0.000000e+00> : vector<2xf32>
    %39 = vector.multi_reduction <add>, %38, %cst_19 [1] : vector<2x128xf32> to vector<2xf32>
    %40 = vector.shape_cast %39 : vector<2xf32> to vector<2x1xf32>
    %cst_20 = arith.constant 1.280000e+02 : f32
    %41 = vector.broadcast %cst_20 : f32 to vector<2x1xf32>
    %42 = arith.divf %40, %41 : vector<2x1xf32>
    %43 = vector.broadcast %35 : vector<2x1xf32> to vector<2x128xf32>
    %44 = arith.subf %31, %43 : vector<2x128xf32>
    %cst_21 = arith.constant 9.99999974E-6 : f32
    %45 = vector.broadcast %cst_21 : f32 to vector<2x1xf32>
    %46 = arith.addf %42, %45 : vector<2x1xf32>
    %47 = math.rsqrt %46 : vector<2x1xf32>
    %48 = vector.broadcast %47 : vector<2x1xf32> to vector<2x128xf32>
    %49 = arith.mulf %44, %48 : vector<2x128xf32>
    %c0_22 = arith.constant 0 : index
    %c0_23 = arith.constant 0 : index
    %50 = vector.load %arg7[%c0_22, %c0_23] : memref<1x128xf32, #tpu.memory_space<vmem>>, vector<1x128xf32>
    %51 = vector.broadcast %50 : vector<1x128xf32> to vector<2x128xf32>
    %52 = arith.mulf %49, %51 : vector<2x128xf32>
    %c0_24 = arith.constant 0 : index
    %c0_25 = arith.constant 0 : index
    %53 = vector.load %arg8[%c0_24, %c0_25] : memref<1x128xf32, #tpu.memory_space<vmem>>, vector<1x128xf32>
    %54 = vector.broadcast %53 : vector<1x128xf32> to vector<2x128xf32>
    %55 = arith.addf %52, %54 : vector<2x128xf32>
    %cst_26 = arith.constant 0.000000e+00 : f32
    %56 = vector.broadcast %cst_26 : f32 to vector<2x128xf32>
    %57 = arith.maximumf %55, %56 : vector<2x128xf32>
    %58 = arith.truncf %57 : vector<2x128xf32> to vector<2x128xbf16>
    %c0_27 = arith.constant 0 : index
    %c0_28 = arith.constant 0 : index
    %59 = vector.load %arg9[%c0_27, %c0_28] : memref<128x32xbf16, #tpu.memory_space<vmem>>, vector<128x32xbf16>
    %cst_29 = arith.constant dense<0.000000e+00> : vector<2x32xf32>
    %60 = tpu.matmul %58, %59, %cst_29 {dimension_numbers = #tpu.dot_dimension_numbers<[1], [0], [0], [1], [0, 0, 1, 1], [], []>} : vector<2x128xbf16>, vector<128x32xbf16>, vector<2x32xf32> -> vector<2x32xf32>
    %c0_30 = arith.constant 0 : index
    %c0_31 = arith.constant 0 : index
    %61 = vector.load %arg10[%c0_30, %c0_31] : memref<2x32xf32, #tpu.memory_space<vmem>>, vector<2x32xf32>
    tpu.vector_store %arg10[%c0_30, %c0_31], %60 {strides = array<i32>} : memref<2x32xf32, #tpu.memory_space<vmem>>, vector<2x32xf32>,
    return
  }
  func.func @transform_0(%arg0: i32) -> (i32, i32) {
    %c0_i32 = arith.constant 0 : i32
    %c0_i32_0 = arith.constant 0 : i32
    return %arg0, %c0_i32 : i32, i32
  }
  func.func @transform_1(%arg0: i32) -> (i32, i32, i32) {
    %c0_i32 = arith.constant 0 : i32
    %c0_i32_0 = arith.constant 0 : i32
    %c0_i32_1 = arith.constant 0 : i32
    return %arg0, %c0_i32, %c0_i32_0 : i32, i32, i32
  }
  func.func @transform_2(%arg0: i32) -> (i32, i32) {
    %c0_i32 = arith.constant 0 : i32
    %c0_i32_0 = arith.constant 0 : i32
    %c0_i32_1 = arith.constant 0 : i32
    return %c0_i32, %c0_i32_0 : i32, i32
  }
  func.func @transform_3(%arg0: i32) -> (i32, i32) {
    %c0_i32 = arith.constant 0 : i32
    %c0_i32_0 = arith.constant 0 : i32
    %c0_i32_1 = arith.constant 0 : i32
    return %c0_i32, %c0_i32_0 : i32, i32
  }
  func.func @transform_4(%arg0: i32) -> (i32, i32) {
    %c0_i32 = arith.constant 0 : i32
    %c0_i32_0 = arith.constant 0 : i32
    %c0_i32_1 = arith.constant 0 : i32
    return %c0_i32, %c0_i32_0 : i32, i32
  }
  func.func @transform_5(%arg0: i32) -> (i32, i32) {
    %c0_i32 = arith.constant 0 : i32
    %c0_i32_0 = arith.constant 0 : i32
    %c0_i32_1 = arith.constant 0 : i32
    return %c0_i32, %c0_i32_0 : i32, i32
  }
  func.func @transform_6(%arg0: i32) -> (i32, i32) {
    %c0_i32 = arith.constant 0 : i32
    %c0_i32_0 = arith.constant 0 : i32
    %c0_i32_1 = arith.constant 0 : i32
    return %c0_i32, %c0_i32_0 : i32, i32
  }
  func.func @transform_7(%arg0: i32) -> (i32, i32) {
    %c0_i32 = arith.constant 0 : i32
    %c0_i32_0 = arith.constant 0 : i32
    %c0_i32_1 = arith.constant 0 : i32
    return %c0_i32, %c0_i32_0 : i32, i32
  }
  func.func @transform_8(%arg0: i32) -> (i32, i32) {
    %c0_i32 = arith.constant 0 : i32
    %c0_i32_0 = arith.constant 0 : i32
    %c0_i32_1 = arith.constant 0 : i32
    return %c0_i32, %c0_i32_0 : i32, i32
  }
  func.func @transform_9(%arg0: i32) -> (i32, i32) {
    %c0_i32 = arith.constant 0 : i32
    %c0_i32_0 = arith.constant 0 : i32
    return %arg0, %c0_i32 : i32, i32
  }
}

</mosaic_0001>

<bundles_post_ra>
// kernel: tpu_custom_call.1
= control target key start
LH: loop header
LB: loop body
LE: loop exit
PB: predicated region body
PF: predicated region fallthrough
CT: control target
= control target key end

     0   :  { %14 = vsyncpa [#allocation3], 0  ;;  %s654_s0 = inlined_call_operand.vmem [shape: bf16[2,16], index: 0, kind: input, shape index: {}]   ;;  %s655_s1 = inlined_call_operand.vmem [shape: bf16[2,8,16], index: 1, kind: input, shape index: {}]   ;;  %s656_s2 = inlined_call_operand.vmem [shape: bf16[16,128], index: 2, kind: input, shape index: {}]   ;;  %s657_s3 = inlined_call_operand.vmem [shape: f32[1,128], index: 3, kind: input, shape index: {}]   ;;  %s658_s4 = inlined_call_operand.vmem [shape: bf16[16,256], index: 4, kind: input, shape index: {}]   ;;  %s659_s5 = inlined_call_operand.hbm [shape: f32[128,128], index: 5, kind: input, shape index: {}]   ;;  %s660_s6 = inlined_call_operand.vmem [shape: f32[1,128], index: 6, kind: input, shape index: {}]   ;;  %s661_s7 = inlined_call_operand.vmem [shape: f32[1,128], index: 7, kind: input, shape index: {}]   ;;  %s662_s8 = inlined_call_operand.vmem [shape: bf16[128,32], index: 8, kind: input, shape index: {}]   ;;  %s663_s9 = inlined_call_operand.hbm [shape: f32[2,32], index: 9, kind: output, shape index: {}]  }
   0x1   :  { %15 = vsyncpa [#allocation4], 0  ;;  %s30_s11 = sshll.u32 %s659_s5, 4  ;;  %s531_s12 = smov [#allocation2]   ;;  %s31_s11 = int_to_ptr.hbm [resolvable:$true] %s30_s11 }
   0x2   :  { %s32_s13 = sshll.u32 %s531_s12, 4  ;;  %s532_s14 = smov 128   ;;  %s33_s13 = int_to_ptr.vmem [resolvable:$true] %s32_s13 }
   0x3   :  { %s533_s15 = smov 8  }
   0x4   :  { %38 = dma.hbm_to_vmem [thread:$0]  %s31_s11, 2048, %s33_s13, [#allocation3], %s532_s14, %s532_s14, %s533_s15  }
   0x5   :  { %527 = dma.done.wait [#allocation3], 2048  }
   0x6   :  { %528 = vsyncadd [#allocation3], 4294965248  ;;  %v448_v0 = vld [vmem:[%s656_s2] sm:$0xff]  ;;  %v450_v2 = vld [vmem:[%s658_s4 + $0x4] sm:$0xf0]  ;;  %vm65_vm0 = vcmask 130048  }
   0x7   :  { %v407_v1 = vld [vmem:[%s658_s4] sm:$0xf]  ;;  %v153_v3 = vld [vmem:[#allocation2 + $0x78] sm:$0xff]  ;;  %76 = vmatpush.bf16.msra.mxu1 %v448_v0  ;;  %v152_v6 = vld [vmem:[#allocation2 + $0x70] sm:$0xff]  ;;  %vm227_vm1 = vcmask 1041409   ;;  %vm230_vm2 = vcmask 1041408  }
   0x8   :  { %v50_v4 = vld [vmem:[%s654_s0] sm:$0x1]  ;;  %v408_v5 = vor.u32 %v450_v2, %v407_v1  ;;  %154 = vmatpush.msra.mxu3 %v153_v3  ;;  %v151_v7 = vld [vmem:[#allocation2 + $0x68] sm:$0xff]  ;;  %v149_v9 = vld [vmem:[#allocation2 + $0x58] sm:$0xff]  ;;  %s386_s0 = sshll.u32 %s663_s9, 4  ;;  %vm377_vm7 = vcmask 254976   ;;  %s387_s0 = int_to_ptr.hbm [resolvable:$true] %s386_s0 }
   0x9   :  { %v150_v8 = vld [vmem:[#allocation2 + $0x60] sm:$0xff]  ;;  %v148_v10 = vld [vmem:[#allocation2 + $0x50] sm:$0xff]  ;;  %v147_v12 = vld [vmem:[#allocation2 + $0x48] sm:$0xff] }
   0xa   :  { %155 = vmatpush.msra.mxu3 %v152_v6  ;;  %400 = vmatmul.msk.bf16.vlgmr.msra.gmra.mxu1 %vm65_vm0, %v50_v4  ;;  %v447_v11 = vld [vmem:[%s655_s1] sm:$0xff]  ;;  %v145_v14 = vld [vmem:[#allocation2 + $0x38] sm:$0xff]  ;;  %v144_v15 = vld [vmem:[#allocation2 + $0x30] sm:$0xff] }
   0xb   :  { %109 = vmatpush.bf16.msrb.mxu1 %v408_v5  ;;  %v146_v13 = vld [vmem:[#allocation2 + $0x40] sm:$0xff]  ;;  %v143_v16 = vld [vmem:[#allocation2 + $0x28] sm:$0xff]  ;;  %v141_v18 = vld [vmem:[#allocation2 + $0x18] sm:$0xff] }
   0xc   :  { %156 = vmatpush.msra.mxu3 %v151_v7  ;;  %v142_v17 = vld [vmem:[#allocation2 + $0x20] sm:$0xff]  ;;  %v140_v19 = vld [vmem:[#allocation2 + $0x10] sm:$0xff]  ;;  %v139_v20 = vld [vmem:[#allocation2 + $0x8] sm:$0xff] }
   0xd   :  { %v138_v21 = vld [vmem:[#allocation2] sm:$0xff]  ;;  %v409_v23 = vld [vmem:[%s658_s4 + $0x8] sm:$0xf0] }
   0xe   :  { %157 = vmatpush.msra.mxu3 %v150_v8  ;;  %v449_v22 = vld [vmem:[%s658_s4 + $0x4] sm:$0xf]  ;;  %v464_v26 = vld [vmem:[%s657_s3] ss:$0 sm:$0xff] }
   0xf   :  { %v412_v24 = vor.u32 %v449_v22, %v409_v23 }
  0x10   :  { %158 = vmatpush.msra.mxu3 %v149_v9 }
  0x11   :  { %123 = vmatpush.bf16.msra.mxu2 %v412_v24 }
  0x12   :  { %159 = vmatpush.msra.mxu3 %v148_v10 }
  0x14   :  { %160 = vmatpush.msra.mxu3 %v147_v12  ;;  %414 = vmatmul.msk.bf16.vlgmr.msra.gmra.mxu2 %vm65_vm0, %v447_v11 }
  0x16   :  { %161 = vmatpush.msra.mxu3 %v146_v13 }
  0x18   :  { %162 = vmatpush.msra.mxu3 %v145_v14 }
  0x1a   :  { %413 = vmatmul.msk.bf16.vlgmr.msrb.gmra.mxu1 %vm65_vm0, %v447_v11  ;;  %163 = vmatpush.msra.mxu3 %v144_v15 }
  0x1c   :  { %164 = vmatpush.msra.mxu3 %v143_v16 }
  0x1e   :  { %165 = vmatpush.msra.mxu3 %v142_v17 }
  0x20   :  { %166 = vmatpush.msra.mxu3 %v141_v18 }
  0x22   :  { %167 = vmatpush.msra.mxu3 %v140_v19 }
  0x24   :  { %168 = vmatpush.msra.mxu3 %v139_v20 }
  0x26   :  { %169 = vmatpush.msra.mxu3 %v138_v21 }
  0x87   :  { %v78_v25 = vpop.f32.mrf.mxu1 }
  0x88   :  { %v79_v28 = vadd.f32 %v464_v26, %v78_v25  ;;  %v534_v26 = vmov 128.0  }
  0x8a   :  { %v132_v29 = vperm.slane %v79_v28, 0  ;;  %v131_v32 = vrot.slane %v79_v28, 1 }
  0x8c   :  { %v133_v33 = vperm.slane %v131_v32, 0 }
  0x8f   :  { %v80_v27 = vpop.f32.mrf.mxu1 }
  0x97   :  { %v111_v30 = vpop.f32.mrf.mxu1  ;;  %v125_v4 = vpop.f32.mrf.mxu2 }
  0x98   :  { %v136_v31 = vmul.f32 %v132_v29, %v111_v30 }
  0x9a   :  { %170 = vmatmul.f32.vlgmr.msra.gmra.mxu3 %v136_v31 }
  0x9f   :  { %v113_v34 = vpop.f32.mrf.mxu1  ;;  %v127_v12 = vpop.f32.mrf.mxu2 }
  0xa0   :  { %v137_v35 = vmul.f32 %v133_v33, %v113_v34 }
  0xa2   :  { %173 = vmatmul.f32.gmra.mxu3 %v137_v35 }
 0x11d   :  { %v171_v36 = vpop.f32.mrf.mxu3 }
 0x11e   :  { %v177_v37 = vrot.slane %v171_v36, 4 }
 0x120   :  { %v178_v38 = vmax.f32 %v171_v36, %v177_v37 }
 0x122   :  { %v179_v39 = vrot.slane %v178_v38, 2 }
 0x124   :  { %v180_v40 = vmax.f32 %v178_v38, %v179_v39 }
 0x125   :  { %v174_v41 = vpop.f32.mrf.mxu3 }
 0x126   :  { %v181_v42 = vrot.slane %v180_v40, 1  ;;  %v183_v43 = vrot.slane %v174_v41, 4 }
 0x128   :  { %v182_v44 = vmax.f32 %v180_v40, %v181_v42  ;;  %v184_v45 = vmax.f32 %v174_v41, %v183_v43  ;;  %v458_v43 = vld [vmem:[%s662_s8 + $0x38] sm:$0xff] }
 0x129   :  { %364 = vmatpush.bf16.msra.mxu0 %v458_v43 }
 0x12a   :  { %v189_v46 = vsub.f32 %v171_v36, %v182_v44  ;;  %v185_v47 = vrot.slane %v184_v45, 2  ;;  %v457_v44 = vld [vmem:[%s662_s8 + $0x30] sm:$0xff] }
 0x12c   :  { %v191_v48 = vmul.f32 1.442695, %v189_v46  ;;  %v186_v49 = vmax.f32 %v184_v45, %v185_v47  ;;  %v456_v45 = vld [vmem:[%s662_s8 + $0x28] sm:$0xff]  ;;  %v455_v46 = vld [vmem:[%s662_s8 + $0x20] sm:$0xff]  ;;  %v454_v47 = vld [vmem:[%s662_s8 + $0x18] sm:$0xff] }
 0x12d   :  { %365 = vmatpush.bf16.msra.mxu0 %v457_v44 }
 0x12e   :  { %467 = vpow2.f32 %v191_v48  ;;  %v187_v50 = vrot.slane %v186_v49, 1  ;;  %v453_v48 = vld [vmem:[%s662_s8 + $0x10] sm:$0xff] }
 0x130   :  { %v188_v51 = vmax.f32 %v186_v49, %v187_v50  ;;  %v452_v49 = vld [vmem:[%s662_s8 + $0x8] sm:$0xff] }
 0x131   :  { %366 = vmatpush.bf16.msra.mxu0 %v456_v45 }
 0x132   :  { %v190_v52 = vsub.f32 %v174_v41, %v188_v51 }
 0x134   :  { %v468_v53 = vpop.eup %467  ;;  %v193_v54 = vmul.f32 1.442695, %v190_v52 }
 0x135   :  { %v195_v55 = vrot.slane %v468_v53, 4  ;;  %367 = vmatpush.bf16.msra.mxu0 %v455_v46 }
 0x136   :  { %469 = vpow2.f32 %v193_v54 }
 0x137   :  { %v196_v56 = vadd.f32 %v468_v53, %v195_v55 }
 0x139   :  { %v197_v57 = vrot.slane %v196_v56, 2  ;;  %368 = vmatpush.bf16.msra.mxu0 %v454_v47 }
 0x13b   :  { %v198_v58 = vadd.f32 %v197_v57, %v196_v56 }
 0x13c   :  { %v470_v59 = vpop.eup %469 }
 0x13d   :  { %v199_v60 = vrot.slane %v198_v58, 1  ;;  %v201_v61 = vrot.slane %v470_v59, 4  ;;  %369 = vmatpush.bf16.msra.mxu0 %v453_v48 }
 0x13f   :  { %v200_v62 = vadd.f32 %v199_v60, %v198_v58  ;;  %v202_v63 = vadd.f32 %v470_v59, %v201_v61  ;;  %v465_v60 = vld [vmem:[%s660_s6] ss:$0 sm:$0xff]  ;;  %s535_s6 = smov [#allocation5]  }
 0x140   :  { %s384_s2 = sshll.u32 %s535_s6, 4  ;;  %s385_s2 = int_to_ptr.vmem [resolvable:$true] %s384_s2 }
 0x141   :  { %471 = vrcp.f32 %v200_v62  ;;  %v203_v0 = vrot.slane %v202_v63, 2  ;;  %370 = vmatpush.bf16.msra.mxu0 %v452_v49 }
 0x143   :  { %v204_v1 = vadd.f32 %v203_v0, %v202_v63  ;;  %v466_v0 = vld [vmem:[%s661_s7] ss:$0 sm:$0xff] }
 0x145   :  { %v205_v2 = vrot.slane %v204_v1, 1 }
 0x147   :  { %v472_v3 = vpop.eup %471  ;;  %v206_v5 = vadd.f32 %v205_v2, %v204_v1 }
 0x148   :  { %v209_v6 = vmul.f32 %v472_v3, %v468_v53  ;;  %v451_v53 = vld [vmem:[%s662_s8] sm:$0xff] }
 0x149   :  { %473 = vrcp.f32 %v206_v5  ;;  %371 = vmatpush.bf16.msra.mxu0 %v451_v53 }
 0x14a   :  { %v211_v7 = vmul.f32 %v209_v6, %v125_v4  ;;  %475 = vrcp.f32 %v534_v26 }
 0x14c   :  { %v213_v8 = vrot.slane %v211_v7, 4 }
 0x14e   :  { %v214_v9 = vadd.f32 %v213_v8, %v211_v7 }
 0x14f   :  { %v474_v10 = vpop.eup %473 }
 0x150   :  { %v210_v11 = vmul.f32 %v474_v10, %v470_v59  ;;  %v215_v13 = vrot.slane %v214_v9, 2  ;;  %v476_v27 = vpop.eup %475 }
 0x151   :  { %v235_v28 = vmul.f32 128.0, %v476_v27  ;;  %vm239_vm3 = vweird.f32 %v476_v27 }
 0x152   :  { %v212_v14 = vmul.f32 %v210_v11, %v127_v12  ;;  %v216_v16 = vadd.f32 %v215_v13, %v214_v9 }
 0x153   :  { %v236_v29 = vsub.f32 1.0, %v235_v28 }
 0x154   :  { %v219_v15 = vrot.slane %v212_v14, 4  ;;  %v217_v19 = vrot.slane %v216_v16, 1 }
 0x155   :  { %v237_v30 = vmul.f32 %v476_v27, %v236_v29 }
 0x156   :  { %v220_v17 = vadd.f32 %v219_v15, %v212_v14  ;;  %v218_v22 = vadd.f32 %v217_v19, %v216_v16 }
 0x157   :  { %v238_v31 = vadd.f32 %v476_v27, %v237_v30 }
 0x158   :  { %v221_v18 = vrot.slane %v220_v17, 2 }
 0x159   :  { %v240_v32 = vsel %vm239_vm3, %v476_v27, %v238_v31 }
 0x15a   :  { %v222_v20 = vadd.f32 %v221_v18, %v220_v17 }
 0x15c   :  { %v223_v21 = vrot.slane %v222_v20, 1 }
 0x15e   :  { %v224_v23 = vadd.f32 %v223_v21, %v222_v20 }
 0x160   :  { %v228_v24 = vsel %vm227_vm1, %v224_v23, %v218_v22 }
 0x161   :  { %v231_v25 = vsel %vm230_vm2, %v228_v24, 0.0 }
 0x162   :  { %232 = vadd.xlane.f32.xlu0 %v231_v25 }
 0x1d5   :  { %v233_v33 = vpop.xlane.xlu0 %232 }
 0x1d6   :  { %v241_v34 = vmul.f32 %v240_v32, %v233_v33 }
 0x1d8   :  { %v243_v35 = vrot.slane %v241_v34, 1  ;;  %v246_v36 = vsub.f32 %v218_v22, %v241_v34 }
 0x1da   :  { %v247_v37 = vsub.f32 %v224_v23, %v243_v35  ;;  %v248_v39 = vmul.f32 %v246_v36, %v246_v36 }
 0x1dc   :  { %v249_v38 = vmul.f32 %v247_v37, %v247_v37 }
 0x1de   :  { %v252_v40 = vrot.slane %v249_v38, 7 }
 0x1e0   :  { %v253_v41 = vsel %vm227_vm1, %v252_v40, %v248_v39 }
 0x1e1   :  { %v255_v42 = vsel %vm230_vm2, %v253_v41, 0.0 }
 0x1e2   :  { %256 = vadd.xlane.f32.xlu0 %v255_v42 }
 0x255   :  { %v257_v50 = vpop.xlane.xlu0 %256 }
 0x256   :  { %v258_v51 = vmul.f32 %v257_v50, %v240_v32 }
 0x258   :  { %v259_v52 = vadd.f32 1e-05, %v258_v51 }
 0x25a   :  { %477 = vrsqrt.f32 %v259_v52  ;;  %vm266_vm5 = vweird.f32 %v259_v52 }
 0x260   :  { %v478_v54 = vpop.eup %477 }
 0x261   :  { %v261_v55 = vmul.f32 %v478_v54, %v259_v52  ;;  %vm267_vm4 = vweird.f32 %v478_v54 }
 0x262   :  { %vm268_vm6 = vmor %vm266_vm5, %vm267_vm4 }
 0x263   :  { %v262_v56 = vmul.f32 %v478_v54, %v261_v55 }
 0x265   :  { %v263_v57 = vmul.f32 0.5, %v262_v56 }
 0x267   :  { %v264_v58 = vsub.f32 1.5, %v263_v57 }
 0x269   :  { %v265_v59 = vmul.f32 %v478_v54, %v264_v58 }
 0x26b   :  { %v269_v61 = vsel %vm268_vm6, %v478_v54, %v265_v59 }
 0x26c   :  { %v271_v62 = vrot.slane %v269_v61, 1  ;;  %v274_v63 = vmul.f32 %v269_v61, %v246_v36 }
 0x26e   :  { %v275_v1 = vmul.f32 %v271_v62, %v247_v37  ;;  %v280_v2 = vmul.f32 %v465_v60, %v274_v63 }
 0x270   :  { %v281_v3 = vmul.f32 %v465_v60, %v275_v1  ;;  %v286_v4 = vadd.f32 %v466_v0, %v280_v2 }
 0x272   :  { %v287_v5 = vadd.f32 %v466_v0, %v281_v3  ;;  %v288_v6 = vmax.f32 %v286_v4, 0.0 }
 0x274   :  { %v289_v7 = vmax.f32 %v287_v5, 0.0  ;;  %v290_v8 = vpack.c.bf16 %v288_v6, %v288_v6 }
 0x276   :  { %v291_v9 = vpack.c.bf16 %v289_v7, %v289_v7  ;;  %v310_v11 = vunpack.c.l.b16 %v290_v8 }
 0x278   :  { %v311_v10 = vunpack.c.l.b16 %v291_v9 }
 0x27a   :  { %v312_v12 = vrot.slane %v311_v10, 7 }
 0x27c   :  { %v313_v13 = vsel %vm227_vm1, %v312_v12, %v310_v11 }
 0x27d   :  { %v314_v14 = vpack.c.b16 %v313_v13, %v313_v13 }
 0x27f   :  { %372 = vmatmul.bf16.vlgmr.msra.gmra.mxu0 %v314_v14 }
 0x2fc   :  { %v373_v15 = vpop.f32.mrf.mxu0 }
 0x2fd   :  { %378 = vst.msk [vmem:[#allocation5] sm:$0x3] %vm377_vm7, %v373_v15 }
 0x2fe   :  { %389 = dma.vmem_to_hbm [thread:$0]  %s385_s2, 32, %s387_s0, [#allocation4]  }
 0x304   :  { %v375_v16 = vpop.f32.mrf.mxu0 }
 0x305   :  { %529 = dma.done.wait [#allocation4], 32  }
 0x306   :  { %530 = vsyncadd [#allocation4], 4294967264 }
 0x307   :  { %394 = vsyncpa [#allocation3], 1 }
 0x308   :  { %395 = vsyncpa [#allocation4], 1 }

</bundles_post_ra>
